<compile_context>
chip_gen: v6e
topology: v6e:2x2x1
jax: 0.10.0
libtpu: 0.0.40
codegen_flags: <defaults>
</compile_context>

<pallas_src>
import jax
import jax.numpy as jnp
from jax.experimental import pallas as pl
from jax.experimental.pallas import tpu as pltpu


# Maximum table rows for which the one-hot MXU gather is used.
_ONEHOT_MAX_ROWS = 2048


def _round_up(x, m):
    return ((x + m - 1) // m) * m


def _mf_onehot_kernel(uid_ref, iid_ref, user_w_ref, item_w_ref, out_ref):
    # uid_ref / iid_ref : VMEM int32 (tile_b, 1) -- per-tile id blocks
    # user_w_ref        : VMEM (num_users, D)    -- whole table, resident
    # item_w_ref        : VMEM (num_items, D)
    # out_ref           : VMEM f32 (1, 1, tile_b) -- lane-dense per-tile output
    tile_b = uid_ref.shape[0]
    n_users = user_w_ref.shape[0]
    n_items = item_w_ref.shape[0]

    uid = uid_ref[...]                                   # (tile_b, 1)
    iid = iid_ref[...]                                   # (tile_b, 1)

    # One-hot gather on the MXU: onehot[b, r] = (ids[b] == r).
    ucol = jax.lax.broadcasted_iota(jnp.int32, (tile_b, n_users), 1)
    icol = jax.lax.broadcasted_iota(jnp.int32, (tile_b, n_items), 1)
    onehot_u = (ucol == uid).astype(user_w_ref.dtype)
    onehot_v = (icol == iid).astype(item_w_ref.dtype)

    u = jnp.dot(onehot_u, user_w_ref[...], preferred_element_type=jnp.float32)
    v = jnp.dot(onehot_v, item_w_ref[...], preferred_element_type=jnp.float32)

    prod = u * v                                          # (tile_b, D) f32
    out_ref[...] = jnp.sum(prod, axis=1).reshape(out_ref.shape)


def _mf_gather_kernel(uid_ref, iid_ref, user_w_ref, item_w_ref, out_ref,
                      u_buf, v_buf):
    # Fallback for large (but still VMEM-resident) tables: per-row copies.
    # uid_ref / iid_ref : SMEM int32 (b_pad,)   -- scalar-prefetched ids
    # u_buf / v_buf     : VMEM (tile_b, D)      -- gathered embedding rows
    tile_b, _ = u_buf.shape
    base = pl.multiple_of(pl.program_id(0) * tile_b, tile_b)

    def gather(r, carry):
        uid = uid_ref[base + r]
        iid = iid_ref[base + r]
        u_buf[pl.ds(r, 1), :] = user_w_ref[pl.ds(uid, 1), :]
        v_buf[pl.ds(r, 1), :] = item_w_ref[pl.ds(iid, 1), :]
        return carry

    # TODO(synk): for bf16 tables, copy rows at u32 granularity (pltpu.bitcast)
    # to avoid sublane-pair repacking of single-row bf16 copies.
    jax.lax.fori_loop(0, tile_b, gather, 0, unroll=min(16, tile_b))

    prod = u_buf[...].astype(jnp.float32) * v_buf[...].astype(jnp.float32)
    out_ref[...] = jnp.sum(prod, axis=1).reshape(out_ref.shape)


def _pick_tile_b(B):
    b8 = max(8, _round_up(B, 8))
    if b8 <= 128:
        return b8                               # single tile
    if b8 <= 1024:
        return _round_up((b8 + 1) // 2, 8)      # exactly 2 tiles -> megacore
    return 512                                  # large batches: big tiles


def matrix_factorization_forward(user_ids, item_ids, user_weight, item_weight):
    """Pallas equivalent of MatrixFactorization.forward."""
    B = user_ids.shape[0]
    num_users, D = user_weight.shape
    num_items, D2 = item_weight.shape
    assert D == D2

    # torch.nn.Embedding raises on out-of-range ids; TPU VMEM indexing has no
    # runtime bounds check, so clamp defensively (documented semantic change).
    user_ids = jnp.clip(user_ids.astype(jnp.int32), 0, num_users - 1)
    item_ids = jnp.clip(item_ids.astype(jnp.int32), 0, num_items - 1)

    tile_b = _pick_tile_b(B)
    b_pad = _round_up(B, tile_b)
    num_tiles = b_pad // tile_b
    if b_pad != B:
        pad = b_pad - B
        user_ids = jnp.pad(user_ids, (0, pad))
        item_ids = jnp.pad(item_ids, (0, pad))

    use_onehot = max(num_users, num_items) <= _ONEHOT_MAX_ROWS

    # ---- generation-aware VMEM budget -------------------------------------
    table_bytes = (user_weight.size * user_weight.dtype.itemsize
                   + item_weight.size * item_weight.dtype.itemsize)
    if use_onehot:
        work_bytes = 4 * tile_b * (num_users + num_items)   # one-hot temporaries
        work_bytes += 2 * tile_b * D * 4                     # gathered u, v (f32)
    else:
        work_bytes = 2 * tile_b * D * user_weight.dtype.itemsize  # u_buf, v_buf
    work_bytes += 4 * tile_b * 4 + b_pad * 4                 # out blocks + ids
    needed = table_bytes + work_bytes
    try:
        vmem_cap = int(pltpu.get_tpu_info().vmem_capacity_bytes)
    except Exception:
        vmem_cap = 64 << 20                                  # conservative (v7x per-TC)
    vmem_limit = min(max(int(needed * 1.5) + (2 << 20), 16 << 20),
                     (vmem_cap * 3) // 4)

    out_shape = jax.ShapeDtypeStruct((num_tiles, 1, tile_b), jnp.float32)
    out_spec_shape = (1, 1, tile_b)
    compiler_params = pltpu.CompilerParams(
        dimension_semantics=("parallel",),   # per-tile output blocks -> megacore
        vmem_limit_bytes=vmem_limit,
    )

    if use_onehot:
        uid2 = user_ids.reshape(b_pad, 1)
        iid2 = item_ids.reshape(b_pad, 1)
        out = pl.pallas_call(
            _mf_onehot_kernel,
            out_shape=out_shape,
            grid=(num_tiles,),
            in_specs=[
                pl.BlockSpec((tile_b, 1), lambda t: (t, 0)),
                pl.BlockSpec((tile_b, 1), lambda t: (t, 0)),
                # Whole tables resident in VMEM: no blocking, no double-buffering.
                pl.BlockSpec(memory_space=pltpu.MemorySpace.VMEM),
                pl.BlockSpec(memory_space=pltpu.MemorySpace.VMEM),
            ],
            out_specs=pl.BlockSpec(out_spec_shape, lambda t: (t, 0, 0)),
            compiler_params=compiler_params,
        )(uid2, iid2, user_weight, item_weight)
    else:
        out = pl.pallas_call(
            _mf_gather_kernel,
            out_shape=out_shape,
            grid_spec=pltpu.PrefetchScalarGridSpec(
                num_scalar_prefetch=2,              # user_ids, item_ids -> SMEM
                grid=(num_tiles,),
                in_specs=[
                    pl.BlockSpec(memory_space=pltpu.MemorySpace.VMEM),
                    pl.BlockSpec(memory_space=pltpu.MemorySpace.VMEM),
                ],
                out_specs=pl.BlockSpec(out_spec_shape,
                                       lambda t, uid, iid: (t, 0, 0)),
                scratch_shapes=[
                    pltpu.VMEM((tile_b, D), user_weight.dtype),
                    pltpu.VMEM((tile_b, D), item_weight.dtype),
                ],
            ),
            compiler_params=compiler_params,
        )(user_ids, item_ids, user_weight, item_weight)

    return out.reshape(b_pad)[:B]


if __name__ == "__main__":
    # Deterministic synthetic parameters (nn.init.normal_(std=0.1)).
    num_users, num_items, embedding_dim = 64, 96, 128
    batch = 8

    key = jax.random.PRNGKey(0)
    k_uw, k_iw, k_uid, k_iid = jax.random.split(key, 4)

    user_weight = 0.1 * jax.random.normal(k_uw, (num_users, embedding_dim), jnp.float32)
    item_weight = 0.1 * jax.random.normal(k_iw, (num_items, embedding_dim), jnp.float32)

    user_ids = jax.random.randint(k_uid, (batch,), 0, num_users, dtype=jnp.int32)
    item_ids = jax.random.randint(k_iid, (batch,), 0, num_items, dtype=jnp.int32)

    out = matrix_factorization_forward(user_ids, item_ids, user_weight, item_weight)
    out = jax.block_until_ready(out)

    # Pure-JAX reference check.
    ref = jnp.sum(user_weight[user_ids] * item_weight[item_ids], axis=1)
    assert out.shape == (batch,)
    assert jnp.allclose(out, ref, atol=1e-5, rtol=1e-5), (out, ref)

    print("KERNEL_OK")
</pallas_src>

<mosaic_0001>
module attributes {stable_mosaic.version = 11 : i64} {
  func.func @_mf_onehot_kernel(%arg0: i32, %arg1: memref<8x1xi32, #tpu.memory_space<vmem>>, %arg2: memref<8x1xi32, #tpu.memory_space<vmem>>, %arg3: memref<64x128xf32, #tpu.memory_space<vmem>>, %arg4: memref<96x128xf32, #tpu.memory_space<vmem>>, %arg5: memref<1x1x8xf32, #tpu.memory_space<vmem>>) attributes {dimension_semantics = [#tpu.dimension_semantics<parallel>], iteration_bounds = array<i64: 1>, scalar_prefetch = 0 : i64, scratch_operands = 0 : i64, tpu.core_type = #tpu.core_type<tc>, window_params = [{transform_indices = @transform_0, window_bounds = array<i64: 8, 1>}, {transform_indices = @transform_1, window_bounds = array<i64: 8, 1>}, {pipeline_mode = #tpu.pipeline_mode<synchronous>, transform_indices = @transform_2, window_bounds = array<i64: 64, 128>}, {pipeline_mode = #tpu.pipeline_mode<synchronous>, transform_indices = @transform_3, window_bounds = array<i64: 96, 128>}, {transform_indices = @transform_4, window_bounds = array<i64: 1, 1, 8>}]} {
    %c0 = arith.constant 0 : index
    %c0_0 = arith.constant 0 : index
    %0 = vector.load %arg1[%c0, %c0_0] : memref<8x1xi32, #tpu.memory_space<vmem>>, vector<8x1xi32>
    %c0_1 = arith.constant 0 : index
    %c0_2 = arith.constant 0 : index
    %1 = vector.load %arg2[%c0_1, %c0_2] : memref<8x1xi32, #tpu.memory_space<vmem>>, vector<8x1xi32>
    %2 = tpu.iota {dimensions = array<i32: 1>} : vector<8x64xi32>
    %3 = tpu.iota {dimensions = array<i32: 1>} : vector<8x96xi32>
    %4 = vector.broadcast %0 : vector<8x1xi32> to vector<8x64xi32>
    %5 = arith.cmpi eq, %2, %4 : vector<8x64xi32>
    %6 = arith.extui %5 : vector<8x64xi1> to vector<8x64xi32>
    %7 = arith.sitofp %6 : vector<8x64xi32> to vector<8x64xf32>
    %8 = vector.broadcast %1 : vector<8x1xi32> to vector<8x96xi32>
    %9 = arith.cmpi eq, %3, %8 : vector<8x96xi32>
    %10 = arith.extui %9 : vector<8x96xi1> to vector<8x96xi32>
    %11 = arith.sitofp %10 : vector<8x96xi32> to vector<8x96xf32>
    %c0_3 = arith.constant 0 : index
    %c0_4 = arith.constant 0 : index
    %12 = vector.load %arg3[%c0_3, %c0_4] : memref<64x128xf32, #tpu.memory_space<vmem>>, vector<64x128xf32>
    %cst = arith.constant dense<0.000000e+00> : vector<8x128xf32>
    %13 = tpu.matmul %7, %12, %cst {dimension_numbers = #tpu.dot_dimension_numbers<[1], [0], [0], [1], [0, 0, 1, 1], [], []>} : vector<8x64xf32>, vector<64x128xf32>, vector<8x128xf32> -> vector<8x128xf32>
    %c0_5 = arith.constant 0 : index
    %c0_6 = arith.constant 0 : index
    %14 = vector.load %arg4[%c0_5, %c0_6] : memref<96x128xf32, #tpu.memory_space<vmem>>, vector<96x128xf32>
    %cst_7 = arith.constant dense<0.000000e+00> : vector<8x128xf32>
    %15 = tpu.matmul %11, %14, %cst_7 {dimension_numbers = #tpu.dot_dimension_numbers<[1], [0], [0], [1], [0, 0, 1, 1], [], []>} : vector<8x96xf32>, vector<96x128xf32>, vector<8x128xf32> -> vector<8x128xf32>
    %16 = arith.mulf %13, %15 : vector<8x128xf32>
    %cst_8 = arith.constant dense<0.000000e+00> : vector<8xf32>
    %17 = vector.multi_reduction <add>, %16, %cst_8 [1] : vector<8x128xf32> to vector<8xf32>
    %18 = vector.shape_cast %17 : vector<8xf32> to vector<1x1x8xf32>
    %c0_9 = arith.constant 0 : index
    %c0_10 = arith.constant 0 : index
    %c0_11 = arith.constant 0 : index
    %19 = vector.load %arg5[%c0_9, %c0_10, %c0_11] : memref<1x1x8xf32, #tpu.memory_space<vmem>>, vector<1x1x8xf32>
    tpu.vector_store %arg5[%c0_9, %c0_10, %c0_11], %18 {strides = array<i32>} : memref<1x1x8xf32, #tpu.memory_space<vmem>>, vector<1x1x8xf32>,
    return
  }
  func.func @transform_0(%arg0: i32) -> (i32, i32) {
    %c0_i32 = arith.constant 0 : i32
    %c0_i32_0 = arith.constant 0 : i32
    return %arg0, %c0_i32 : i32, i32
  }
  func.func @transform_1(%arg0: i32) -> (i32, i32) {
    %c0_i32 = arith.constant 0 : i32
    %c0_i32_0 = arith.constant 0 : i32
    return %arg0, %c0_i32 : i32, i32
  }
  func.func @transform_2(%arg0: i32) -> (i32, i32) {
    %c0_i32 = arith.constant 0 : i32
    %c0_i32_0 = arith.constant 0 : i32
    %c0_i32_1 = arith.constant 0 : i32
    return %c0_i32, %c0_i32_0 : i32, i32
  }
  func.func @transform_3(%arg0: i32) -> (i32, i32) {
    %c0_i32 = arith.constant 0 : i32
    %c0_i32_0 = arith.constant 0 : i32
    %c0_i32_1 = arith.constant 0 : i32
    return %c0_i32, %c0_i32_0 : i32, i32
  }
  func.func @transform_4(%arg0: i32) -> (i32, i32, i32) {
    %c0_i32 = arith.constant 0 : i32
    %c0_i32_0 = arith.constant 0 : i32
    %c0_i32_1 = arith.constant 0 : i32
    return %arg0, %c0_i32, %c0_i32_0 : i32, i32, i32
  }
}

</mosaic_0001>

<bundles_post_ra>
// kernel: tpu_custom_call.1
= control target key start
LH: loop header
LB: loop body
LE: loop exit
PB: predicated region body
PF: predicated region fallthrough
CT: control target
= control target key end

     0   :  { %9 = vsyncpa [#allocation3], 0  ;;  %s476_s0 = inlined_call_operand.vmem [shape: s32[8,1], index: 0, kind: input, shape index: {}]   ;;  %s477_s1 = inlined_call_operand.vmem [shape: s32[8,1], index: 1, kind: input, shape index: {}]   ;;  %s478_s2 = inlined_call_operand.hbm [shape: f32[64,128], index: 2, kind: input, shape index: {}]   ;;  %s479_s3 = inlined_call_operand.hbm [shape: f32[96,128], index: 3, kind: input, shape index: {}]   ;;  %s480_s4 = inlined_call_operand.hbm [shape: f32[1,1,8], index: 4, kind: output, shape index: {}]  }
   0x1   :  { %10 = vsyncpa [#allocation6], 0 }
   0x2   :  { %11 = vsyncpa [#allocation4], 0  ;;  %s404_s15 = smov [#allocation2]  }
   0x3   :  { %s21_s16 = sshll.u32 %s404_s15, 4  ;;  %s22_s16 = int_to_ptr.vmem [resolvable:$true] %s21_s16 }
   0x4   :  { %s346_s17 = scalar_lea.vmem %s22_s16, 1024  ;;  %p351_p1 = scmp.lt.s32.totalorder %s22_s16, %s22_s16 }
   0x5   :  { %p347_p0 = scmp.ne.s32.totalorder %s22_s16, %s346_s17  ;;  %p352_p2 = scmp.lt.s32.totalorder %s346_s17, %s346_s17 }
   0x7   :  { %p353_p3 = por %p352_p2, %p351_p1 }
   0x9   :  { %p354_p4 = pnand %p353_p3, %p347_p0 }
   0xb   :  { %357 = shalt.err (!%p354_p4)
}
   0xc   :  { %s405_s18 = smov 128   ;;  %s406_s19 = smov 8  }
   0xd   :  { %27 = dma.hbm_to_vmem [thread:$0]  %s478_s2, 1024, %s22_s16, [#allocation3], %s405_s18, %s405_s18, %s406_s19  }
   0xe   :  { %s407_s22 = smov [#allocation5]  }
   0xf   :  { %s33_s23 = sshll.u32 %s407_s22, 4  ;;  %s34_s23 = int_to_ptr.vmem [resolvable:$true] %s33_s23 }
  0x10   :  { %s366_s24 = scalar_lea.vmem %s34_s23, 1536  ;;  %p371_p6 = scmp.lt.s32.totalorder %s34_s23, %s34_s23 }
  0x11   :  { %p367_p5 = scmp.ne.s32.totalorder %s34_s23, %s366_s24  ;;  %p372_p7 = scmp.lt.s32.totalorder %s366_s24, %s366_s24 }
  0x13   :  { %p373_p8 = por %p372_p7, %p371_p6 }
  0x15   :  { %p374_p9 = pnand %p373_p8, %p367_p5 }
  0x17   :  { %377 = shalt.err (!%p374_p9)
}
  0x18   :  { %39 = dma.hbm_to_vmem [thread:$0]  %s479_s3, 1536, %s34_s23, [#allocation6], %s405_s18, %s405_s18, %s406_s19  }
  0x19   :  { %398 = dma.done.wait [#allocation3], 1024  }
  0x1a   :  { %399 = vsyncadd [#allocation3], 4294966272 }
  0x1b   :  { %400 = dma.done.wait [#allocation6], 1536  }
  0x1c   :  { %401 = vsyncadd [#allocation6], 4294965760  ;;  %v408_v0 = vmov 0   ;;  %v409_v1 = vmov 0.0   ;;  %vm410_vm0 = vmmov 0   ;;  %v46_v2 = vld [vmem:[%s476_s0] sm:$0xff]  ;;  %v48_v24 = vlaneseq }
  0x1d   :  { %337 = vset.pattern.permute.xlu0 %v408_v0  ;;  %302 = vmatprep.subr.mxu1 %v409_v1  ;;  %v155_v3 = vld [vmem:[#allocation5 + $0x58] sm:$0xff]  ;;  %v154_v4 = vld [vmem:[#allocation5 + $0x50] sm:$0xff]  ;;  %v47_v6 = vld [vmem:[%s477_s1] sm:$0xff]  ;;  %vm70_vm1 = vcmask 523264   ;;  %vm156_vm3 = vcmask 785408   ;;  %s411_s0 = smov [#allocation7]  }
  0x1e   :  { %283 = vmatprep.subr.mxu0 %v409_v1  ;;  %299 = vmatprep.mubr.msk.f32.mxu0 %vm410_vm0, %v409_v1  ;;  %v69_v5 = vld [vmem:[#allocation2 + $0x38] sm:$0xff]  ;;  %v153_v7 = vld [vmem:[#allocation5 + $0x48] sm:$0xff]  ;;  %v68_v8 = vld [vmem:[#allocation2 + $0x30] sm:$0xff]  ;;  %v49_v25 = vand.u32 127, %v48_v24  ;;  %v235_v35 = vshrl.u32 %v48_v24, 7  ;;  %s247_s1 = sshll.u32 %s411_s0, 4  ;;  %s248_s1 = int_to_ptr.vmem [resolvable:$true] %s247_s1 }
  0x1f   :  { %326 = vmatprep.mubr.msk.f32.mxu1 %vm410_vm0, %v409_v1  ;;  %51 = vperm.xlu0 %337, %v46_v2   ;;  %v152_v9 = vld [vmem:[#allocation5 + $0x40] sm:$0xff]  ;;  %v67_v10 = vld [vmem:[#allocation2 + $0x28] sm:$0xff]  ;;  %v151_v11 = vld [vmem:[#allocation5 + $0x38] sm:$0xff]  ;;  %vm239_vm5 = vcmask 57344   ;;  %s378_s29 = scalar_lea.vmem %s248_s1, 16  ;;  %s382_s30 = scalar_lea.vmem %s248_s1, 32 }
  0x20   :  { %303 = vmatpush3.msra.mxu1 %v155_v3  ;;  %284 = vmatpush3.msra.mxu0 %v69_v5  ;;  %v66_v12 = vld [vmem:[#allocation2 + $0x20] sm:$0xff]  ;;  %v150_v13 = vld [vmem:[#allocation5 + $0x30] sm:$0xff]  ;;  %v65_v14 = vld [vmem:[#allocation2 + $0x18] sm:$0xff]  ;;  %v236_v36 = vsub.s32 %v49_v25, %v235_v35  ;;  %p379_p10 = scmp.ne.s32.totalorder %s248_s1, %s378_s29  ;;  %p383_p11 = scmp.lt.s32.totalorder %s248_s1, %s248_s1 }
  0x21   :  { %304 = vmatprep.subr.mxu1 %v409_v1  ;;  %285 = vmatprep.subr.mxu0 %v409_v1  ;;  %v149_v15 = vld [vmem:[#allocation5 + $0x28] sm:$0xff]  ;;  %v64_v16 = vld [vmem:[#allocation2 + $0x10] sm:$0xff]  ;;  %v148_v17 = vld [vmem:[#allocation5 + $0x20] sm:$0xff]  ;;  %p384_p12 = scmp.lt.s32.totalorder %s382_s30, %s378_s29 }
  0x22   :  { %305 = vmatpush3.msra.mxu1 %v154_v4  ;;  %286 = vmatpush3.msra.mxu0 %v68_v8  ;;  %v63_v18 = vld [vmem:[#allocation2 + $0x8] sm:$0xff]  ;;  %v147_v19 = vld [vmem:[#allocation5 + $0x18] sm:$0xff]  ;;  %v62_v20 = vld [vmem:[#allocation2] sm:$0xff] }
  0x23   :  { %306 = vmatprep.subr.mxu1 %v409_v1  ;;  %57 = vperm.xlu0 %337, %v47_v6   ;;  %v146_v21 = vld [vmem:[#allocation5 + $0x10] sm:$0xff]  ;;  %v145_v22 = vld [vmem:[#allocation5 + $0x8] sm:$0xff]  ;;  %v144_v23 = vld [vmem:[#allocation5] sm:$0xff]  ;;  %p385_p13 = por %p384_p12, %p383_p11 }
  0x24   :  { %307 = vmatpush3.msra.mxu1 %v153_v7  ;;  %287 = vmatprep.subr.mxu0 %v409_v1 }
  0x25   :  { %308 = vmatprep.subr.mxu1 %v409_v1  ;;  %288 = vmatpush3.msra.mxu0 %v67_v10  ;;  %p386_p0 = pnand %p385_p13, %p379_p10 }
  0x26   :  { %309 = vmatpush3.msra.mxu1 %v152_v9  ;;  %289 = vmatprep.subr.mxu0 %v409_v1 }
  0x27   :  { %310 = vmatprep.subr.mxu1 %v409_v1  ;;  %290 = vmatpush3.msra.mxu0 %v66_v12 }
  0x28   :  { %311 = vmatpush3.msra.mxu1 %v151_v11  ;;  %291 = vmatprep.subr.mxu0 %v409_v1 }
  0x29   :  { %312 = vmatprep.subr.mxu1 %v409_v1  ;;  %292 = vmatpush3.msra.mxu0 %v65_v14 }
  0x2a   :  { %313 = vmatpush3.msra.mxu1 %v150_v13  ;;  %293 = vmatprep.subr.mxu0 %v409_v1 }
  0x2b   :  { %314 = vmatprep.subr.mxu1 %v409_v1  ;;  %294 = vmatpush3.msra.mxu0 %v64_v16 }
  0x2c   :  { %315 = vmatpush3.msra.mxu1 %v149_v15  ;;  %295 = vmatprep.subr.mxu0 %v409_v1 }
  0x2d   :  { %316 = vmatprep.subr.mxu1 %v409_v1  ;;  %296 = vmatpush3.msra.mxu0 %v63_v18 }
  0x2e   :  { %317 = vmatpush3.msra.mxu1 %v148_v17  ;;  %297 = vmatprep.subr.mxu0 %v409_v1 }
  0x2f   :  { %318 = vmatprep.subr.mxu1 %v409_v1  ;;  %298 = vmatpush3.msra.mxu0 %v62_v20 }
  0x30   :  { %319 = vmatpush3.msra.mxu1 %v147_v19 }
  0x31   :  { %320 = vmatprep.subr.mxu1 %v409_v1 }
  0x32   :  { %321 = vmatpush3.msra.mxu1 %v146_v21 }
  0x33   :  { %322 = vmatprep.subr.mxu1 %v409_v1 }
  0x34   :  { %323 = vmatpush3.msra.mxu1 %v145_v22 }
  0x35   :  { %324 = vmatprep.subr.mxu1 %v409_v1 }
  0x36   :  { %325 = vmatpush3.msra.mxu1 %v144_v23 }
  0x9a   :  { %v52_v26 = vpop.permute.xlu0 %51 }
  0x9b   :  { %vm53_vm2 = vcmp.eq.s32.totalorder %v49_v25, %v52_v26 }
  0x9c   :  { %v257_v27 = vsel %vm53_vm2, 1.0, %v409_v1 }
  0x9d   :  { %300 = vmatmul.mubr.msk.f32.vlgmr.msra.gmra.mxu0 %vm70_vm1, %v257_v27 }
  0x9e   :  { %v58_v28 = vpop.permute.xlu0 %57 }
  0x9f   :  { %vm59_vm4 = vcmp.eq.s32.totalorder %v49_v25, %v58_v28 }
  0xa0   :  { %v258_v29 = vsel %vm59_vm4, 1.0, %v409_v1 }
  0xa1   :  { %327 = vmatmul.mubr.msk.f32.vlgmr.msra.gmra.mxu1 %vm156_vm3, %v258_v29 }
 0x15d   :  { %v140_v30 = vpop.f32.mrf.mxu0 }
 0x15f   :  { %v301_v31 = vpop.f32.mrf.mxu0 }
 0x161   :  { %v226_v32 = vpop.f32.mrf.mxu1 }
 0x162   :  { %v230_v33 = vmul.f32 %v226_v32, %v140_v30 }
 0x163   :  { %v328_v34 = vpop.f32.mrf.mxu1 }
 0x164   :  { %231 = vadd.xlane.f32.xlu1 %v230_v33 }
 0x1ed   :  { %v232_v37 = vpop.xlane.xlu1 %231 }
 0x1ee   :  { %v237_v38 = vrot.slane %v232_v37, %v236_v36 }
 0x1f0   :  { %240 = vst.msk [vmem:[#allocation7] sm:$0x1] %vm239_vm5, %v237_v38 }
 0x1f1   :  { %389 = shalt.err (!%p386_p0)
}
 0x1f2   :  { %250 = dma.vmem_to_hbm [thread:$0]  %s248_s1, 16, %s480_s4, [#allocation4]  }
 0x1f3   :  { %402 = dma.done.wait [#allocation4], 16  }
 0x1f4   :  { %403 = vsyncadd [#allocation4], 4294967280 }
 0x1f5   :  { %254 = vsyncpa [#allocation3], 1 }
 0x1f6   :  { %255 = vsyncpa [#allocation6], 1 }
 0x1f7   :  { %256 = vsyncpa [#allocation4], 1 }

</bundles_post_ra>
